<compile_context>
chip_gen: v7x
topology: tpu7x:2x2x1
jax: 0.10.0
libtpu: 0.0.40
codegen_flags: <defaults>
</compile_context>

<pallas_src>
import jax
import jax.numpy as jnp
from jax.experimental import pallas as pl
from jax.experimental.pallas import tpu as pltpu


def _round_up(x, m):
    return (x + m - 1) // m * m


def _pick_divisor(dim, candidates):
    for c in candidates:
        if c <= dim and dim % c == 0:
            return c
    return dim


def _detect_vmem_bytes():
    try:
        info = pltpu.get_tpu_info()
        cap = getattr(info, "vmem_capacity_bytes", None)
        if cap:
            return int(cap)
    except Exception:
        pass
    return 64 << 20  # conservative default (v7x per-core VMEM)


_VMEM_CAP = _detect_vmem_bytes()
# Leave headroom for compiler-internal scratch / semaphores / DMA descriptors.
_VMEM_BUDGET = max(32 << 20, min(_VMEM_CAP - (8 << 20), 100 << 20))


# ---------------------------------------------------------------------------
# Pass 1: affine translator (with residual) + LayerNorm.
#   grid = (row tiles, K-chunks of d_model); K axis is a reduction ("arbitrary").
#   Emits `normed` in bf16 (MXU input dtype for the unembed pass).
# ---------------------------------------------------------------------------
def _make_translator_ln_kernel(num_k):
    def kernel(idx_ref, h_k_ref, wt_ref, bt_ref, g_ref, b_ref, normed_ref,
               acc_ref):
        del idx_ref  # only consumed by the index_maps (scalar prefetch)
        k = pl.program_id(1)
        tk = h_k_ref.shape[1]

        @pl.when(k == 0)
        def _():
            acc_ref[...] = jnp.zeros_like(acc_ref)

        h_k = h_k_ref[...]  # (tm, tk) f32 -- the ONLY h stream
        # bf16 x bf16 on the MXU, f32 accumulation.
        acc_ref[...] += jnp.dot(h_k.astype(jnp.bfloat16), wt_ref[...],
                                preferred_element_type=jnp.float32)
        # Residual folded per K-step: h's K-slice maps onto the same column
        # block of the (square) translator output, so it is added exactly
        # once per column, in f32, with no second full-row read of h.
        if num_k == 1:
            acc_ref[...] += h_k
        else:
            col = pl.multiple_of(k * tk, tk)
            acc_ref[:, pl.ds(col, tk)] += h_k

        @pl.when(k == num_k - 1)
        def _():
            # Bias added into the accumulator (in place), then LayerNorm
            # (eps=1e-5, torch defaults) in f32.
            acc_ref[...] += bt_ref[...]
            t = acc_ref[...]
            mean = jnp.mean(t, axis=-1, keepdims=True)
            var = jnp.mean((t - mean) * (t - mean), axis=-1, keepdims=True)
            normed = (t - mean) * jax.lax.rsqrt(var + 1e-5)
            normed_ref[...] = (normed * g_ref[...] + b_ref[...]
                               ).astype(normed_ref.dtype)

    return kernel


# ---------------------------------------------------------------------------
# Pass 2: unembed.  grid = (vocab tiles OUTER, row tiles inner), both parallel.
# W_U is streamed from HBM once; normed (much smaller) is re-fetched instead.
# ---------------------------------------------------------------------------
def _unembed_kernel(x_ref, wu_ref, out_ref):
    out_ref[...] = jnp.dot(x_ref[...], wu_ref[...],
                           preferred_element_type=jnp.float32
                           ).astype(out_ref.dtype)


@jax.jit
def _lens_forward_2d(h2d, idx_arr, wt_all, bt_all, gamma, beta, wu_p):
    """h2d: (N, D) f32, idx_arr: (1,) i32, wt_all: (L, D, D) bf16,
    bt_all: (L, 1, D) f32, gamma/beta: (1, D) f32,
    wu_p: (D, Vp) bf16 (vocab pre-padded to a multiple of 128 in __init__)
    -> logits (N, Vp) f32."""
    n, d = h2d.shape
    vp = wu_p.shape[1]

    # --------------------------- pass 1 tiles -------------------------------
    tm1 = _pick_divisor(n, (512, 256, 128, 64, 32, 16, 8))
    tk = _pick_divisor(d, (1024, 512, 256, 128))

    def p1_bytes(tm, tk_):
        return (2 * (tm * tk_ * 4        # h K-slice (f32, double-buffered)
                     + tk_ * d * 2       # W_t chunk (bf16)
                     + tm * d * 2)       # normed out tile (bf16)
                + 3 * tm * d * 4         # f32 accumulator + LN epilogue temps
                + 2 * 3 * d * 4)         # b_t, gamma, beta

    while p1_bytes(tm1, tk) > _VMEM_BUDGET:
        if tk > 128 and d % (tk // 2) == 0:
            tk //= 2
        elif tm1 > 128 and n % (tm1 // 2) == 0:
            tm1 //= 2
        else:
            break
    # v7x has 2 TensorCores: keep >= 2 blocks on the (parallel) row axis.
    while n // tm1 < 2 and tm1 >= 32 and n % (tm1 // 2) == 0:
        tm1 //= 2

    num_k = d // tk
    vmem1 = min(_VMEM_BUDGET, max(32 << 20, p1_bytes(tm1, tk) + (8 << 20)))

    normed = pl.pallas_call(
        _make_translator_ln_kernel(num_k),
        out_shape=jax.ShapeDtypeStruct((n, d), jnp.bfloat16),
        grid_spec=pltpu.PrefetchScalarGridSpec(
            num_scalar_prefetch=1,
            grid=(n // tm1, num_k),
            in_specs=[
                # h, K-slice (single h stream; residual folded in-kernel)
                pl.BlockSpec((tm1, tk), lambda i, k, idx: (i, k)),
                # W_t[idx], streamed as (tk, D) chunks (layer picked in-kernel)
                pl.BlockSpec((None, tk, d), lambda i, k, idx: (idx[0], k, 0)),
                # b_t[idx]
                pl.BlockSpec((None, 1, d), lambda i, k, idx: (idx[0], 0, 0)),
                # gamma, beta
                pl.BlockSpec((1, d), lambda i, k, idx: (0, 0)),
                pl.BlockSpec((1, d), lambda i, k, idx: (0, 0)),
            ],
            out_specs=pl.BlockSpec((tm1, d), lambda i, k, idx: (i, 0)),
            scratch_shapes=[pltpu.VMEM((tm1, d), jnp.float32)],
        ),
        compiler_params=pltpu.CompilerParams(
            dimension_semantics=("parallel", "arbitrary"),
            vmem_limit_bytes=vmem1),
        cost_estimate=pl.CostEstimate(
            flops=2 * n * d * d + 10 * n * d,
            transcendentals=n,
            bytes_accessed=(n * d * 4                    # h read once
                            + (n // tm1) * d * d * 2      # W_t per row tile
                            + n * d * 2                   # normed write
                            + 6 * d * 4)),
    )(idx_arr, h2d, wt_all, bt_all, gamma, beta)

    # --------------------------- pass 2 tiles -------------------------------
    tm2 = _pick_divisor(n, (512, 256, 128, 64, 32, 16, 8))
    tv_pref = 2048 if _VMEM_CAP >= (100 << 20) else 1024   # v6e/v5e vs v7x
    tv = _pick_divisor(vp, (tv_pref, 1024, 512, 256, 128))

    def p2_bytes(tm, tv_):
        return 2 * (tm * d * 2 + d * tv_ * 2 + tm * tv_ * 4)

    while p2_bytes(tm2, tv) > _VMEM_BUDGET:
        if tv > 512 and vp % (tv // 2) == 0:
            tv //= 2
        elif tm2 > 128 and n % (tm2 // 2) == 0:
            tm2 //= 2
        elif tv > 128 and vp % (tv // 2) == 0:
            tv //= 2
        else:
            break

    vmem2 = min(_VMEM_BUDGET, max(32 << 20, p2_bytes(tm2, tv) + (8 << 20)))

    # TODO(synk): emitting bf16 logits or fusing the downstream log-softmax/KL
    # here (online max/sum across vocab tiles, padded lanes masked) would
    # remove the N*V f32 writeback entirely; kept f32 to match module dtype.
    logits = pl.pallas_call(
        _unembed_kernel,
        out_shape=jax.ShapeDtypeStruct((n, vp), jnp.float32),
        grid_spec=pltpu.PrefetchScalarGridSpec(
            num_scalar_prefetch=0,
            grid=(vp // tv, n // tm2),                     # vocab OUTER
            in_specs=[
                pl.BlockSpec((tm2, d), lambda j, i: (i, 0)),   # normed rows
                pl.BlockSpec((d, tv), lambda j, i: (0, j)),    # W_U vocab tile
            ],
            out_specs=pl.BlockSpec((tm2, tv), lambda j, i: (i, j)),
        ),
        compiler_params=pltpu.CompilerParams(
            dimension_semantics=("parallel", "parallel"),
            vmem_limit_bytes=vmem2),
        cost_estimate=pl.CostEstimate(
            flops=2 * n * d * vp,
            transcendentals=0,
            bytes_accessed=((vp // tv) * n * d * 2   # normed per vocab tile
                            + d * vp * 2             # W_U read once
                            + n * vp * 4)),          # logits write
    )(normed, wu_p)

    return logits


class PallasTunedLens:
    """Concrete `Lens`: per-layer affine translators + shared LayerNorm unembed."""

    def __init__(self, num_layers, d_model, vocab_size, key):
        k1, k2 = jax.random.split(key)
        scale = 1.0 / jnp.sqrt(jnp.float32(d_model))
        self.vocab_size = vocab_size
        # Per-layer translator params (stacked; layer selected in-kernel via
        # scalar prefetch).  Weights stored bf16 for MXU / HBM efficiency.
        self.wt = (0.02 * jax.random.normal(
            k1, (num_layers, d_model, d_model), dtype=jnp.float32)
        ).astype(jnp.bfloat16)
        self.bt = jnp.zeros((num_layers, 1, d_model), dtype=jnp.float32)
        # Unembed: final LayerNorm affine params + unembedding matrix.
        self.gamma = jnp.ones((1, d_model), dtype=jnp.float32)
        self.beta = jnp.zeros((1, d_model), dtype=jnp.float32)
        wu = scale * jax.random.normal(k2, (d_model, vocab_size),
                                       dtype=jnp.float32)
        # Pad vocab to a multiple of 128 ONCE here (zero columns) so the
        # per-call path never re-materializes a padded copy of W_U.
        vp = _round_up(vocab_size, 128)
        if vp != vocab_size:
            wu = jnp.pad(wu, ((0, 0), (0, vp - vocab_size)))
        self.wu = wu.astype(jnp.bfloat16)

    def transform_hidden(self, h, idx):
        """Pure-JAX translator (the fused kernel path lives in forward())."""
        wt = self.wt[idx].astype(jnp.float32)
        return h + jnp.einsum("...d,de->...e", h, wt) + self.bt[idx][0]

    def forward(self, h, idx):
        """h: (batch, seq, d_model) f32 -> logits (batch, seq, vocab) f32."""
        b, s, d = h.shape
        h2d = h.reshape(b * s, d)
        idx_arr = jnp.asarray([idx], dtype=jnp.int32)
        logits = _lens_forward_2d(h2d, idx_arr, self.wt, self.bt,
                                  self.gamma, self.beta, self.wu)
        logits = logits.reshape(b, s, -1)
        if logits.shape[-1] != self.vocab_size:
            # Padded W_U columns are zero; drop them for the caller.
            logits = logits[..., :self.vocab_size]
        return logits


def _reference_forward(lens, h, idx):
    """Pure-JAX f32 reference (uses the same bf16-rounded weights)."""
    wt = lens.wt[idx].astype(jnp.float32)
    wu = lens.wu[:, :lens.vocab_size].astype(jnp.float32)
    t = h + jnp.einsum("bsd,de->bse", h, wt) + lens.bt[idx][0]
    mean = jnp.mean(t, axis=-1, keepdims=True)
    var = jnp.mean((t - mean) ** 2, axis=-1, keepdims=True)
    normed = (t - mean) * jax.lax.rsqrt(var + 1e-5)
    normed = normed * lens.gamma[0] + lens.beta[0]
    return jnp.einsum("bsd,dv->bsv", normed, wu)


if __name__ == "__main__":
    key = jax.random.PRNGKey(0)
    k_h, k_p = jax.random.split(key)

    # Small shapes; vocab=250 deliberately not a multiple of 128 to exercise
    # the padded-vocab path.
    batch, seq, d_model, vocab, num_layers = 2, 8, 32, 250, 4
    layer_idx = 2

    h = jax.random.normal(k_h, (batch, seq, d_model), dtype=jnp.float32)
    lens = PallasTunedLens(num_layers, d_model, vocab, k_p)

    logits = lens.forward(h, layer_idx)
    logits = jax.block_until_ready(logits)

    ref = _reference_forward(lens, h, layer_idx)
    assert logits.shape == (batch, seq, vocab)
    max_err = jnp.max(jnp.abs(logits - ref))
    # bf16 matmul operands (h / normed cast on the MXU path, bf16 weights)
    # vs f32 reference; residual + LN stats kept in f32.
    assert jnp.allclose(logits, ref, atol=2e-2, rtol=2e-2), (
        f"mismatch vs reference (max abs err {max_err})")

    print("KERNEL_OK")
</pallas_src>

<mosaic_0001>
module attributes {stable_mosaic.version = 11 : i64} {
  func.func @_unembed_kernel(%arg0: i32, %arg1: i32, %arg2: memref<16x32xbf16, #tpu.memory_space<vmem>>, %arg3: memref<32x256xbf16, #tpu.memory_space<vmem>>, %arg4: memref<16x256xf32, #tpu.memory_space<vmem>>) attributes {dimension_semantics = [#tpu.dimension_semantics<parallel>, #tpu.dimension_semantics<parallel>], iteration_bounds = array<i64: 1, 1>, scalar_prefetch = 0 : i64, scratch_operands = 0 : i64, tpu.core_type = #tpu.core_type<tc>, window_params = [{transform_indices = @transform_0, window_bounds = array<i64: 16, 32>}, {transform_indices = @transform_1, window_bounds = array<i64: 32, 256>}, {transform_indices = @transform_2, window_bounds = array<i64: 16, 256>}]} {
    %c0 = arith.constant 0 : index
    %c0_0 = arith.constant 0 : index
    %0 = vector.load %arg2[%c0, %c0_0] : memref<16x32xbf16, #tpu.memory_space<vmem>>, vector<16x32xbf16>
    %c0_1 = arith.constant 0 : index
    %c0_2 = arith.constant 0 : index
    %1 = vector.load %arg3[%c0_1, %c0_2] : memref<32x256xbf16, #tpu.memory_space<vmem>>, vector<32x256xbf16>
    %cst = arith.constant dense<0.000000e+00> : vector<16x256xf32>
    %2 = tpu.matmul %0, %1, %cst {dimension_numbers = #tpu.dot_dimension_numbers<[1], [0], [0], [1], [0, 0, 1, 1], [], []>} : vector<16x32xbf16>, vector<32x256xbf16>, vector<16x256xf32> -> vector<16x256xf32>
    %c0_3 = arith.constant 0 : index
    %c0_4 = arith.constant 0 : index
    %3 = vector.load %arg4[%c0_3, %c0_4] : memref<16x256xf32, #tpu.memory_space<vmem>>, vector<16x256xf32>
    tpu.vector_store %arg4[%c0_3, %c0_4], %2 {strides = array<i32>} : memref<16x256xf32, #tpu.memory_space<vmem>>, vector<16x256xf32>,
    return
  }
  func.func @transform_0(%arg0: i32, %arg1: i32) -> (i32, i32) {
    %c0_i32 = arith.constant 0 : i32
    %c0_i32_0 = arith.constant 0 : i32
    return %arg1, %c0_i32 : i32, i32
  }
  func.func @transform_1(%arg0: i32, %arg1: i32) -> (i32, i32) {
    %c0_i32 = arith.constant 0 : i32
    %c0_i32_0 = arith.constant 0 : i32
    return %c0_i32, %arg0 : i32, i32
  }
  func.func @transform_2(%arg0: i32, %arg1: i32) -> (i32, i32) {
    %c0_i32 = arith.constant 0 : i32
    return %arg1, %arg0 : i32, i32
  }
}

module attributes {stable_mosaic.version = 11 : i64} {
  func.func @kernel(%arg0: i32, %arg1: i32, %arg2: memref<1xi32, #tpu.memory_space<smem>>, %arg3: memref<16x32xf32, #tpu.memory_space<vmem>>, %arg4: memref<1x32x32xbf16, #tpu.memory_space<vmem>>, %arg5: memref<1x1x32xf32, #tpu.memory_space<vmem>>, %arg6: memref<1x32xf32, #tpu.memory_space<vmem>>, %arg7: memref<1x32xf32, #tpu.memory_space<vmem>>, %arg8: memref<16x32xbf16, #tpu.memory_space<vmem>>, %arg9: memref<16x32xf32, #tpu.memory_space<vmem>>) attributes {dimension_semantics = [#tpu.dimension_semantics<parallel>, #tpu.dimension_semantics<arbitrary>], iteration_bounds = array<i64: 1, 1>, scalar_prefetch = 1 : i64, scratch_operands = 1 : i64, tpu.core_type = #tpu.core_type<tc>, window_params = [{transform_indices = @transform_0, window_bounds = array<i64: 16, 32>}, {transform_indices = @transform_1, window_bounds = array<i64: 1, 32, 32>}, {transform_indices = @transform_2, window_bounds = array<i64: 1, 1, 32>}, {pipeline_mode = #tpu.pipeline_mode<synchronous>, transform_indices = @transform_3, window_bounds = array<i64: 1, 32>}, {pipeline_mode = #tpu.pipeline_mode<synchronous>, transform_indices = @transform_4, window_bounds = array<i64: 1, 32>}, {transform_indices = @transform_5, window_bounds = array<i64: 16, 32>}]} {
    %c0_i32 = arith.constant 0 : i32
    %0 = arith.cmpi eq, %arg1, %c0_i32 : i32
    %1 = arith.extui %0 : i1 to i32
    %c0_i32_0 = arith.constant 0 : i32
    %2 = arith.cmpi ne, %1, %c0_i32_0 : i32
    scf.if %2 {
      %cst_15 = arith.constant 0.000000e+00 : f32
      %17 = vector.broadcast %cst_15 : f32 to vector<16x32xf32>
      %c0_16 = arith.constant 0 : index
      %c0_17 = arith.constant 0 : index
      %18 = vector.load %arg9[%c0_16, %c0_17] : memref<16x32xf32, #tpu.memory_space<vmem>>, vector<16x32xf32>
      tpu.vector_store %arg9[%c0_16, %c0_17], %17 {strides = array<i32>} : memref<16x32xf32, #tpu.memory_space<vmem>>, vector<16x32xf32>,
    } else {
    }
    %c0 = arith.constant 0 : index
    %c0_1 = arith.constant 0 : index
    %3 = vector.load %arg3[%c0, %c0_1] : memref<16x32xf32, #tpu.memory_space<vmem>>, vector<16x32xf32>
    %c0_2 = arith.constant 0 : index
    %c0_3 = arith.constant 0 : index
    %4 = vector.load %arg9[%c0_2, %c0_3] : memref<16x32xf32, #tpu.memory_space<vmem>>, vector<16x32xf32>
    %5 = arith.truncf %3 : vector<16x32xf32> to vector<16x32xbf16>
    %c0_4 = arith.constant 0 : index
    %c0_5 = arith.constant 0 : index
    %c0_6 = arith.constant 0 : index
    %6 = vector.load %arg4[%c0_4, %c0_5, %c0_6] : memref<1x32x32xbf16, #tpu.memory_space<vmem>>, vector<1x32x32xbf16>
    %7 = vector.shape_cast %6 : vector<1x32x32xbf16> to vector<32x32xbf16>
    %cst = arith.constant dense<0.000000e+00> : vector<16x32xf32>
    %8 = tpu.matmul %5, %7, %cst {dimension_numbers = #tpu.dot_dimension_numbers<[1], [0], [0], [1], [0, 0, 1, 1], [], []>} : vector<16x32xbf16>, vector<32x32xbf16>, vector<16x32xf32> -> vector<16x32xf32>
    %9 = arith.addf %4, %8 : vector<16x32xf32>
    %c0_7 = arith.constant 0 : index
    %c0_8 = arith.constant 0 : index
    %10 = vector.load %arg9[%c0_7, %c0_8] : memref<16x32xf32, #tpu.memory_space<vmem>>, vector<16x32xf32>
    tpu.vector_store %arg9[%c0_7, %c0_8], %9 {strides = array<i32>} : memref<16x32xf32, #tpu.memory_space<vmem>>, vector<16x32xf32>,
    %c0_9 = arith.constant 0 : index
    %c0_10 = arith.constant 0 : index
    %11 = vector.load %arg9[%c0_9, %c0_10] : memref<16x32xf32, #tpu.memory_space<vmem>>, vector<16x32xf32>
    %12 = arith.addf %11, %3 : vector<16x32xf32>
    %c0_11 = arith.constant 0 : index
    %c0_12 = arith.constant 0 : index
    %13 = vector.load %arg9[%c0_11, %c0_12] : memref<16x32xf32, #tpu.memory_space<vmem>>, vector<16x32xf32>
    tpu.vector_store %arg9[%c0_11, %c0_12], %12 {strides = array<i32>} : memref<16x32xf32, #tpu.memory_space<vmem>>, vector<16x32xf32>,
    %c0_i32_13 = arith.constant 0 : i32
    %14 = arith.cmpi eq, %arg1, %c0_i32_13 : i32
    %15 = arith.extui %14 : i1 to i32
    %c0_i32_14 = arith.constant 0 : i32
    %16 = arith.cmpi ne, %15, %c0_i32_14 : i32
    scf.if %16 {
      %c0_15 = arith.constant 0 : index
      %c0_16 = arith.constant 0 : index
      %17 = vector.load %arg9[%c0_15, %c0_16] : memref<16x32xf32, #tpu.memory_space<vmem>>, vector<16x32xf32>
      %c0_17 = arith.constant 0 : index
      %c0_18 = arith.constant 0 : index
      %c0_19 = arith.constant 0 : index
      %18 = vector.load %arg5[%c0_17, %c0_18, %c0_19] : memref<1x1x32xf32, #tpu.memory_space<vmem>>, vector<1x1x32xf32>
      %19 = vector.shape_cast %18 : vector<1x1x32xf32> to vector<1x32xf32>
      %20 = vector.broadcast %19 : vector<1x32xf32> to vector<16x32xf32>
      %21 = arith.addf %17, %20 : vector<16x32xf32>
      %c0_20 = arith.constant 0 : index
      %c0_21 = arith.constant 0 : index
      %22 = vector.load %arg9[%c0_20, %c0_21] : memref<16x32xf32, #tpu.memory_space<vmem>>, vector<16x32xf32>
      tpu.vector_store %arg9[%c0_20, %c0_21], %21 {strides = array<i32>} : memref<16x32xf32, #tpu.memory_space<vmem>>, vector<16x32xf32>,
      %c0_22 = arith.constant 0 : index
      %c0_23 = arith.constant 0 : index
      %23 = vector.load %arg9[%c0_22, %c0_23] : memref<16x32xf32, #tpu.memory_space<vmem>>, vector<16x32xf32>
      %cst_24 = arith.constant dense<0.000000e+00> : vector<16xf32>
      %24 = vector.multi_reduction <add>, %23, %cst_24 [1] : vector<16x32xf32> to vector<16xf32>
      %25 = vector.shape_cast %24 : vector<16xf32> to vector<16x1xf32>
      %cst_25 = arith.constant 3.200000e+01 : f32
      %26 = vector.broadcast %cst_25 : f32 to vector<16x1xf32>
      %27 = arith.divf %25, %26 : vector<16x1xf32>
      %28 = vector.broadcast %27 : vector<16x1xf32> to vector<16x32xf32>
      %29 = arith.subf %23, %28 : vector<16x32xf32>
      %30 = vector.broadcast %27 : vector<16x1xf32> to vector<16x32xf32>
      %31 = arith.subf %23, %30 : vector<16x32xf32>
      %32 = arith.mulf %29, %31 : vector<16x32xf32>
      %cst_26 = arith.constant dense<0.000000e+00> : vector<16xf32>
      %33 = vector.multi_reduction <add>, %32, %cst_26 [1] : vector<16x32xf32> to vector<16xf32>
      %34 = vector.shape_cast %33 : vector<16xf32> to vector<16x1xf32>
      %cst_27 = arith.constant 3.200000e+01 : f32
      %35 = vector.broadcast %cst_27 : f32 to vector<16x1xf32>
      %36 = arith.divf %34, %35 : vector<16x1xf32>
      %37 = vector.broadcast %27 : vector<16x1xf32> to vector<16x32xf32>
      %38 = arith.subf %23, %37 : vector<16x32xf32>
      %cst_28 = arith.constant 9.99999974E-6 : f32
      %39 = vector.broadcast %cst_28 : f32 to vector<16x1xf32>
      %40 = arith.addf %36, %39 : vector<16x1xf32>
      %41 = math.rsqrt %40 : vector<16x1xf32>
      %42 = vector.broadcast %41 : vector<16x1xf32> to vector<16x32xf32>
      %43 = arith.mulf %38, %42 : vector<16x32xf32>
      %c0_29 = arith.constant 0 : index
      %c0_30 = arith.constant 0 : index
      %44 = vector.load %arg6[%c0_29, %c0_30] : memref<1x32xf32, #tpu.memory_space<vmem>>, vector<1x32xf32>
      %45 = vector.broadcast %44 : vector<1x32xf32> to vector<16x32xf32>
      %46 = arith.mulf %43, %45 : vector<16x32xf32>
      %c0_31 = arith.constant 0 : index
      %c0_32 = arith.constant 0 : index
      %47 = vector.load %arg7[%c0_31, %c0_32] : memref<1x32xf32, #tpu.memory_space<vmem>>, vector<1x32xf32>
      %48 = vector.broadcast %47 : vector<1x32xf32> to vector<16x32xf32>
      %49 = arith.addf %46, %48 : vector<16x32xf32>
      %50 = arith.truncf %49 : vector<16x32xf32> to vector<16x32xbf16>
      %c0_33 = arith.constant 0 : index
      %c0_34 = arith.constant 0 : index
      %51 = vector.load %arg8[%c0_33, %c0_34] : memref<16x32xbf16, #tpu.memory_space<vmem>>, vector<16x32xbf16>
      tpu.vector_store %arg8[%c0_33, %c0_34], %50 {strides = array<i32>} : memref<16x32xbf16, #tpu.memory_space<vmem>>, vector<16x32xbf16>,
    } else {
    }
    return
  }
  func.func @transform_0(%arg0: i32, %arg1: i32, %arg2: memref<1xi32, #tpu.memory_space<smem>>) -> (i32, i32) {
    %c0_i32 = arith.constant 0 : i32
    return %arg0, %arg1 : i32, i32
  }
  func.func @transform_1(%arg0: i32, %arg1: i32, %arg2: memref<1xi32, #tpu.memory_space<smem>>) -> (i32, i32, i32) {
    %c0 = arith.constant 0 : index
    %0 = memref.load %arg2[%c0] : memref<1xi32, #tpu.memory_space<smem>>
    %c0_i32 = arith.constant 0 : i32
    %c0_i32_0 = arith.constant 0 : i32
    return %0, %arg1, %c0_i32 : i32, i32, i32
  }
  func.func @transform_2(%arg0: i32, %arg1: i32, %arg2: memref<1xi32, #tpu.memory_space<smem>>) -> (i32, i32, i32) {
    %c0 = arith.constant 0 : index
    %0 = memref.load %arg2[%c0] : memref<1xi32, #tpu.memory_space<smem>>
    %c0_i32 = arith.constant 0 : i32
    %c0_i32_0 = arith.constant 0 : i32
    %c0_i32_1 = arith.constant 0 : i32
    return %0, %c0_i32, %c0_i32_0 : i32, i32, i32
  }
  func.func @transform_3(%arg0: i32, %arg1: i32, %arg2: memref<1xi32, #tpu.memory_space<smem>>) -> (i32, i32) {
    %c0_i32 = arith.constant 0 : i32
    %c0_i32_0 = arith.constant 0 : i32
    %c0_i32_1 = arith.constant 0 : i32
    return %c0_i32, %c0_i32_0 : i32, i32
  }
  func.func @transform_4(%arg0: i32, %arg1: i32, %arg2: memref<1xi32, #tpu.memory_space<smem>>) -> (i32, i32) {
    %c0_i32 = arith.constant 0 : i32
    %c0_i32_0 = arith.constant 0 : i32
    %c0_i32_1 = arith.constant 0 : i32
    return %c0_i32, %c0_i32_0 : i32, i32
  }
  func.func @transform_5(%arg0: i32, %arg1: i32, %arg2: memref<1xi32, #tpu.memory_space<smem>>) -> (i32, i32) {
    %c0_i32 = arith.constant 0 : i32
    %c0_i32_0 = arith.constant 0 : i32
    return %arg0, %c0_i32 : i32, i32
  }
}

</mosaic_0001>

<bundles_post_ra>
// kernel: _lens_forward_2d.3
= control target key start
LH: loop header
LB: loop body
LE: loop exit
PB: predicated region body
PF: predicated region fallthrough
CT: control target
= control target key end

     0   :  { %v152_v2 = vmov 0   ;;  %s198_s0 = inlined_call_operand.vmem [shape: bf16[16,32], index: 0, kind: input, shape index: {}]   ;;  %s199_s1 = inlined_call_operand.vmem [shape: bf16[32,256], index: 1, kind: input, shape index: {}]   ;;  %s200_s2 = inlined_call_operand.hbm [shape: f32[16,256], index: 2, kind: output, shape index: {}]  }
   0x1   :  { %v121_v0 = vld [vmem:[%s199_s1 + $0x4] ss:$8 sps:$4 sm:$0xff]   ;;  %v123_v1 = vld [vmem:[%s199_s1] ss:$8 sps:$4 sm:$0xff]   ;;  %80 = vmatprep.mubr.bf16.mxu0 %v152_v2  ;;  %v124_v3 = vld [vmem:[%s199_s1 + $0x14] ss:$8 sps:$4 sm:$0xff]  }
   0x2   :  { %48 = vmatprep.subr.bf16.mxu0 %v121_v0  ;;  %v126_v4 = vld [vmem:[%s199_s1 + $0x10] ss:$8 sps:$4 sm:$0xff]  }
   0x3   :  { %49 = vmatpush1.bf16.msra.mxu0 %v123_v1 }
   0x4   :  { %7 = vsyncpa [#allocation3], 0  ;;  %50 = vmatprep.subr.bf16.mxu0 %v124_v3  ;;  %v127_v5 = vld [vmem:[%s198_s0] sm:$0xff]   ;;  %vm44_vm0 = vcmask 261120   ;;  %s153_s19 = smov [#allocation2]  }
   0x5   :  { %s100_s20 = sshll.u32 %s153_s19, 4  ;;  %s101_s20 = int_to_ptr.vmem [resolvable:$true] %s100_s20 }
   0x6   :  { %s128_s1 = scalar_lea.vmem %s101_s20, 512  ;;  %p133_p1 = scmp.lt.s32.totalorder %s101_s20, %s101_s20 }
   0x7   :  { %51 = vmatpush1.bf16.msra.mxu0 %v126_v4  ;;  %p129_p0 = scmp.ne.s32.totalorder %s101_s20, %s128_s1  ;;  %p134_p2 = scmp.lt.s32.totalorder %s128_s1, %s128_s1 }
   0x9   :  { %p135_p3 = por %p134_p2, %p133_p1 }
   0xa   :  { %116 = vmatmul.mubr.msk.bf16.vlgmr.msra.gmra.mrb[0].mxu0 %vm44_vm0, %v127_v5 }
   0xb   :  { %p136_p4 = pnand %p135_p3, %p129_p0 }
  0xdd   :  { %v82_v6 = vpop.f32.mrb[0].mxu0 }
  0xde   :  { %91 = vst [vmem:[#allocation2] sm:$0xff] %v82_v6  ;;  %v84_v7 = vpop.f32.mrb[1].mxu0 }
  0xdf   :  { %92 = vst [vmem:[#allocation2 + $0x8] sm:$0xff] %v84_v7  ;;  %v86_v8 = vpop.f32.mrb[2].mxu0 }
  0xe0   :  { %93 = vst [vmem:[#allocation2 + $0x10] sm:$0xff] %v86_v8  ;;  %v88_v9 = vpop.f32.mrb[3].mxu0 }
  0xe1   :  { %94 = vst [vmem:[#allocation2 + $0x18] sm:$0xff] %v88_v9 }
  0xe2   :  { %139 = shalt.err (!%p136_p4)
}
  0xe3   :  { %s140_s22 = scalar_lea.hbm %s200_s2, 512 }
  0xe4   :  { %p141_p5 = scmp.ne.s32.totalorder %s200_s2, %s140_s22  ;;  %p144_p6 = scmp.lt.u32.totalorder %s140_s22, %s200_s2 }
  0xe6   :  { %p146_p7 = pnand %p144_p6, %p141_p5 }
  0xe8   :  { %149 = shalt.err (!%p146_p7)
}
  0xe9   :  { %s154_s27 = smov 256   ;;  %s155_s28 = smov 16  }
  0xea   :  { %106 = dma.vmem_to_hbm [thread:$0]  %s101_s20, 512, %s200_s2, [#allocation3], %s154_s27, %s154_s27, %s155_s28  }
  0xeb   :  { %150 = dma.done.wait [#allocation3], 512  }
  0xec   :  { %151 = vsyncadd [#allocation3], 4294966784 }
  0xed   :  { %110 = vsyncpa [#allocation3], 1 }

// kernel: _lens_forward_2d.2
= control target key start
LH: loop header
LB: loop body
LE: loop exit
PB: predicated region body
PF: predicated region fallthrough
CT: control target
= control target key end

     0   :  { %12 = vsyncpa [#allocation6], 0  ;;  %s427_s0 = inlined_call_operand.<no memory space> [shape: s32[1], index: 0, kind: input, shape index: {}]   ;;  %s428_s1 = inlined_call_operand.hbm [shape: f32[16,32], index: 1, kind: input, shape index: {}]   ;;  %s429_s2 = inlined_call_operand.hbm [shape: bf16[4,32,32], index: 2, kind: input, shape index: {}]   ;;  %s430_s3 = inlined_call_operand.vmem [shape: f32[4,1,32], index: 3, kind: input, shape index: {}]   ;;  %s431_s4 = inlined_call_operand.vmem [shape: f32[1,32], index: 4, kind: input, shape index: {}]   ;;  %s432_s5 = inlined_call_operand.vmem [shape: f32[1,32], index: 5, kind: input, shape index: {}]   ;;  %s433_s6 = inlined_call_operand.vmem [shape: bf16[16,32], index: 6, kind: output, shape index: {}]  }
   0x1   :  { %13 = vsyncpa [#allocation8], 0  ;;  %s326_s21 = smov [#allocation5]   ;;  %s248_s25 = sshll.u32 %s427_s0, 8 }
   0x2   :  { %s19_s22 = sshll.u32 %s326_s21, 4  ;;  %s276_s28 = scalar_lea.hbm %s428_s1, 256  ;;  %s20_s22 = int_to_ptr.vmem [resolvable:$true] %s19_s22 }
   0x3   :  { %p277_p0 = scmp.ne.s32.totalorder %s428_s1, %s276_s28  ;;  %p280_p1 = scmp.lt.u32.totalorder %s276_s28, %s428_s1 }
   0x5   :  { %p282_p2 = pnand %p280_p1, %p277_p0 }
   0x7   :  { %285 = shalt.err (!%p282_p2)
}
   0x8   :  { %s286_s9 = scalar_lea.vmem %s20_s22, 256  ;;  %p291_p4 = scmp.lt.s32.totalorder %s20_s22, %s20_s22 }
   0x9   :  { %p287_p3 = scmp.ne.s32.totalorder %s20_s22, %s286_s9  ;;  %p292_p5 = scmp.lt.s32.totalorder %s286_s9, %s286_s9 }
   0xb   :  { %p293_p6 = por %p292_p5, %p291_p4 }
   0xd   :  { %p294_p7 = pnand %p293_p6, %p287_p3 }
   0xf   :  { %297 = shalt.err (!%p294_p7)
}
  0x10   :  { %s327_s10 = smov 128   ;;  %s328_s11 = smov 8  }
  0x11   :  { %25 = dma.hbm_to_vmem [thread:$0]  %s428_s1, 256, %s20_s22, [#allocation6], %s327_s10, %s327_s10, %s328_s11  }
  0x12   :  { %s34_s16 = scalar_lea.hbm %s429_s2, %s248_s25  ;;  %s329_s17 = smov [#allocation7]  }
  0x13   :  { %s35_s18 = sshll.u32 %s329_s17, 4  ;;  %s298_s19 = scalar_lea.hbm %s34_s16, 256  ;;  %s36_s18 = int_to_ptr.vmem [resolvable:$true] %s35_s18 }
  0x14   :  { %p299_p8 = scmp.ne.s32.totalorder %s34_s16, %s298_s19  ;;  %s300_s23 = scalar_lea.hbm %s429_s2, 1024 }
  0x15   :  { %p301_p9 = scmp.lt.u32.totalorder %s34_s16, %s429_s2  ;;  %p302_p10 = scmp.lt.u32.totalorder %s300_s23, %s298_s19 }
  0x16   :  { %p304_p12 = scmp.lt.u32.totalorder %s298_s19, %s34_s16 }
  0x17   :  { %p303_p11 = por %p302_p10, %p301_p9 }
  0x19   :  { %p305_p13 = por %p304_p12, %p303_p11 }
  0x1b   :  { %p306_p0 = pnand %p305_p13, %p299_p8 }
  0x1d   :  { %309 = shalt.err (!%p306_p0)
}
  0x1e   :  { %s310_s1 = scalar_lea.vmem %s36_s18, 256  ;;  %p315_p2 = scmp.lt.s32.totalorder %s36_s18, %s36_s18 }
  0x1f   :  { %p311_p1 = scmp.ne.s32.totalorder %s36_s18, %s310_s1  ;;  %p316_p3 = scmp.lt.s32.totalorder %s310_s1, %s310_s1 }
  0x21   :  { %p317_p4 = por %p316_p3, %p315_p2 }
  0x23   :  { %p318_p5 = pnand %p317_p4, %p311_p1 }
  0x25   :  { %321 = shalt.err (!%p318_p5)
}
  0x26   :  { %s330_s22 = smov 64   ;;  %s331_s25 = smov 4  }
  0x27   :  { %41 = dma.hbm_to_vmem [thread:$0]  %s34_s16, 256, %s36_s18, [#allocation8], %s330_s22, %s330_s22, %s331_s25  }
  0x28   :  { %322 = dma.done.wait [#allocation6], 256  }
  0x29   :  { %323 = vsyncadd [#allocation6], 4294967040 }
  0x2a   :  { %324 = dma.done.wait [#allocation8], 256  }
  0x2b   :  { %325 = vsyncadd [#allocation8], 4294967040  ;;  %vm74_vm0 = vcmask 261120   ;;  %v332_v0 = vmov 0.0   ;;  %vm333_vm1 = vmmov 0   ;;  %v270_v1 = vld [vmem:[#allocation7] sm:$0xff]  }
  0x2c   :  { %75 = vst.msk [vmem:[#allocation2] sm:$0xff] %vm74_vm0, %v332_v0  ;;  %76 = vst.msk [vmem:[#allocation2 + $0x8] sm:$0xff] %vm74_vm0, %v332_v0  ;;  %254 = vmatprep.subr.bf16.mxu0 %v332_v0  ;;  %258 = vmatprep.mubr.msk.bf16.mxu0 %vm333_vm1, %v332_v0  ;;  %v271_v2 = vld [vmem:[#allocation7 + $0x8] sm:$0xff]   ;;  %v77_v3 = vld [vmem:[#allocation5] sm:$0xff]  ;;  %p65_p6 = scmp.lt.s32.totalorder %s427_s0, 3  ;;  %vm224_vm2 = vcmask 257024  }
  0x2d   :  { %255 = vmatpush3.bf16.msra.mxu0 %v270_v1  ;;  %v78_v4 = vld [vmem:[#allocation5 + $0x8] sm:$0xff]  ;;  %v244_v44 = vld [vmem:[%s431_s4] ss:$0 sm:$0xff] }
  0x2e   :  { %256 = vmatprep.subr.bf16.mxu0 %v332_v0  ;;  %v81_v5 = vpack.c.bf16 %v78_v4, %v77_v3  ;;  %s435_s0 = smov (!%p65_p6, %s427_s0), 3  ;;  %v245_v46 = vld [vmem:[%s432_s5] ss:$0 sm:$0xff] }
  0x2f   :  { %s67_s8 = scalar_lea.vmem %s430_s3, %s435_s0 }
  0x30   :  { %v243_v18 = vld [vmem:[%s67_s8] ss:$0 sm:$0xff] }
  0x31   :  { %257 = vmatpush3.bf16.msra.mxu0 %v271_v2 }
  0x33   :  { %v79_v6 = vld [vmem:[#allocation2] sm:$0xff]  ;;  %v80_v8 = vld [vmem:[#allocation2 + $0x8] sm:$0xff] }
  0x34   :  { %259 = vmatmul.mubr.msk.bf16.vlgmr.msra.gmra.mrb[0].mxu0 %vm74_vm0, %v81_v5 }
 0x107   :  { %v136_v7 = vpop.f32.mrb[0].mxu0 }
 0x108   :  { %v143_v9 = vadd.f32 %v136_v7, %v79_v6  ;;  %v260_v10 = vpop.f32.mrb[1].mxu0 }
 0x109   :  { %v139_v11 = vpop.f32.mrb[2].mxu0 }
 0x10a   :  { %145 = vst.msk [vmem:[#allocation2] sm:$0xff] %vm74_vm0, %v143_v9  ;;  %v144_v12 = vadd.f32 %v139_v11, %v80_v8  ;;  %v261_v13 = vpop.f32.mrb[3].mxu0 }
 0x10c   :  { %146 = vst.msk [vmem:[#allocation2 + $0x8] sm:$0xff] %vm74_vm0, %v144_v12 }
 0x111   :  { %v147_v14 = vld [vmem:[#allocation2] sm:$0xff] }
 0x112   :  { %v149_v15 = vadd.f32 %v147_v14, %v77_v3 }
 0x113   :  { %v148_v16 = vld [vmem:[#allocation2 + $0x8] sm:$0xff] }
 0x114   :  { %151 = vst.msk [vmem:[#allocation2] sm:$0xff] %vm74_vm0, %v149_v15  ;;  %v150_v17 = vadd.f32 %v148_v16, %v78_v4 }
 0x116   :  { %152 = vst.msk [vmem:[#allocation2 + $0x8] sm:$0xff] %vm74_vm0, %v150_v17 }
 0x11b   :  { %v156_v19 = vld [vmem:[#allocation2] sm:$0xff] }
 0x11c   :  { %v165_v20 = vadd.f32 %v243_v18, %v156_v19 }
 0x11d   :  { %v157_v21 = vld [vmem:[#allocation2 + $0x8] sm:$0xff] }
 0x11e   :  { %167 = vst.msk [vmem:[#allocation2] sm:$0xff] %vm74_vm0, %v165_v20  ;;  %v166_v22 = vadd.f32 %v243_v18, %v157_v21 }
 0x120   :  { %168 = vst.msk [vmem:[#allocation2 + $0x8] sm:$0xff] %vm74_vm0, %v166_v22 }
 0x125   :  { %v169_v23 = vld [vmem:[#allocation2] sm:$0xff] }
 0x126   :  { %v171_v24 = vsel %vm74_vm0, %v169_v23, 0.0 }
 0x127   :  { %172 = vadd.xlane.f32.xlu0 %v171_v24  ;;  %v170_v25 = vld [vmem:[#allocation2 + $0x8] sm:$0xff] }
 0x128   :  { %v174_v26 = vsel %vm74_vm0, %v170_v25, 0.0 }
 0x12b   :  { %175 = vadd.xlane.f32.xlu0 %v174_v26 }
 0x1b4   :  { %v173_v27 = vpop.xlane.xlu0 %172 }
 0x1b5   :  { %v178_v28 = vmul.f32 0.03125, %v173_v27 }
 0x1b7   :  { %v180_v29 = vsub.f32 %v169_v23, %v178_v28 }
 0x1b8   :  { %v176_v30 = vpop.xlane.xlu0 %175 }
 0x1b9   :  { %v179_v31 = vmul.f32 0.03125, %v176_v30  ;;  %v182_v32 = vmul.f32 %v180_v29, %v180_v29 }
 0x1bb   :  { %v181_v33 = vsub.f32 %v170_v25, %v179_v31  ;;  %v184_v34 = vsel %vm74_vm0, %v182_v32, 0.0 }
 0x1bc   :  { %185 = vadd.xlane.f32.xlu1 %v184_v34 }
 0x1bd   :  { %v183_v35 = vmul.f32 %v181_v33, %v181_v33 }
 0x1bf   :  { %v187_v36 = vsel %vm74_vm0, %v183_v35, 0.0 }
 0x1c0   :  { %188 = vadd.xlane.f32.xlu1 %v187_v36 }
 0x249   :  { %v186_v37 = vpop.xlane.xlu1 %185 }
 0x24a   :  { %v190_v38 = vmul.f32 0.03125, %v186_v37 }
 0x24c   :  { %v192_v39 = vadd.f32 1e-05, %v190_v38 }
 0x24d   :  { %v189_v40 = vpop.xlane.xlu1 %188 }
 0x24e   :  { %272 = vrsqrt.f32 %v192_v39  ;;  %v191_v41 = vmul.f32 0.03125, %v189_v40 }
 0x250   :  { %v193_v42 = vadd.f32 1e-05, %v191_v41 }
 0x252   :  { %274 = vrsqrt.f32 %v193_v42 }
 0x258   :  { %v273_v43 = vpop.eup %272 }
 0x259   :  { %v196_v45 = vmul.f32 %v273_v43, %v180_v29 }
 0x25b   :  { %v205_v47 = vmul.f32 %v244_v44, %v196_v45 }
 0x25c   :  { %v275_v48 = vpop.eup %274 }
 0x25d   :  { %v214_v49 = vadd.f32 %v245_v46, %v205_v47  ;;  %v197_v50 = vmul.f32 %v275_v48, %v181_v33 }
 0x25f   :  { %v249_v51 = vpack.c.bf16 %v214_v49, %v214_v49  ;;  %v206_v52 = vmul.f32 %v244_v44, %v197_v50 }
 0x261   :  { %225 = vst.msk [vmem:[%s433_s6] sm:$0xf] %vm224_vm2, %v249_v51  ;;  %v215_v53 = vadd.f32 %v245_v46, %v206_v52 }
 0x263   :  { %v250_v54 = vpack.c.bf16 %v215_v53, %v215_v53 }
 0x265   :  { %226 = vst.msk [vmem:[%s433_s6 + $0x4] sm:$0xf] %vm224_vm2, %v250_v54 }
 0x266   :  { %231 = vsyncpa [#allocation6], 1 }
 0x267   :  { %232 = vsyncpa [#allocation8], 1 }

</bundles_post_ra>
